<compile_context>
chip_gen: v5e
topology: v5e:2x2
jax: 0.10.0
libtpu: 0.0.40
codegen_flags: <defaults>
</compile_context>

<pallas_src>
import functools

import jax
import jax.numpy as jnp
from jax.experimental import pallas as pl
from jax.experimental.pallas import tpu as pltpu

_MIB = 1024 * 1024


def _round_up(x: int, m: int) -> int:
    return ((x + m - 1) // m) * m


def _cdiv(a: int, b: int) -> int:
    return -(-a // b)


@functools.lru_cache(maxsize=1)
def _vmem_capacity_bytes() -> int:
    """Physical VMEM per TensorCore; conservative (v7x-sized) fallback if the query fails."""
    try:
        info = pltpu.get_tpu_info()
        cap = getattr(info, "vmem_capacity_bytes", None)
        if cap:
            return int(cap)
    except Exception:
        pass
    return 64 * _MIB


def _pick_tiling(batch: int):
    """Generation-dependent batch tile + scoped-VMEM budget."""
    cap = _vmem_capacity_bytes()
    if cap >= 100 * _MIB:
        # v5e / v6e: 128 MiB physical VMEM -> big tiles, generous scoped limit.
        tile_target, vmem_limit = 8192, 64 * _MIB
    else:
        # v7x: 64 MiB physical VMEM -> smaller tile cap, keep double-buffering headroom.
        tile_target, vmem_limit = 4096, 40 * _MIB

    tile_b = min(tile_target, _round_up(batch, 8))
    tile_b = _round_up(tile_b, 8)

    # v7x has 2 TensorCores: make sure the "parallel" batch axis has >= 2 grid steps whenever the
    # batch is big enough to split (no-op on single-TC v5e/v6e, harmless either way).
    if _cdiv(batch, tile_b) < 2 and batch >= 16:
        tile_b = _round_up(_cdiv(batch, 2), 8)

    return tile_b, vmem_limit


def _make_mlp_kernel(num_linear: int):
    """Kernel ref order: x, (w0, b0), ..., (w_{n-1}, b_{n-1}), out.

    ReLU follows every Linear except the last.  The final (TILE_B, out_size) activation is written
    as one lane-contiguous store with tanh applied only to the last (value) column.
    """

    def kernel(*refs):
        x_ref = refs[0]
        param_refs = refs[1 : 1 + 2 * num_linear]
        out_ref = refs[1 + 2 * num_linear]

        h = x_ref[...]  # f32 tile straight from HBM (no wrapper cast pass)
        for i in range(num_linear):
            w = param_refs[2 * i][...]        # f32 (in, out), VMEM-resident across grid steps
            b = param_refs[2 * i + 1][...]    # f32 (1, out)
            h = jnp.dot(h, w, preferred_element_type=jnp.float32) + b
            if i < num_linear - 1:
                h = jnp.maximum(h, 0.0)       # ReLU (Dropout identity in eval mode)

        # tanh on the value column only; keep the output lane-dense (single store, free wrapper slice).
        lane = jax.lax.broadcasted_iota(jnp.int32, h.shape, dimension=1)
        out_ref[...] = jnp.where(lane == (h.shape[1] - 1), jnp.tanh(h), h)

    return kernel


@functools.partial(jax.jit, static_argnames=("flatten", "tile_b"))
def simple_alpha_connect4_forward(x, params, *, flatten=True, tile_b=None):
    """params: list of (W, b) with W shape (in, out) [transposed vs PyTorch], b shape (1, out)."""
    if flatten:
        x = x.reshape(x.shape[0], -1)  # nn.Flatten (row-major, matches PyTorch)

    batch, in_size = x.shape
    num_linear = len(params)
    out_size = params[-1][0].shape[1]

    auto_tile, vmem_limit = _pick_tiling(batch)
    if tile_b is None:
        TILE_B = auto_tile
    else:
        TILE_B = _round_up(max(8, min(int(tile_b), _round_up(batch, 8))), 8)

    x = x.astype(jnp.float32)  # no-op when x is already f32 (the common case)

    # x tile walks the batch axis; weights/biases stay resident (constant block index).
    in_specs = [pl.BlockSpec((TILE_B, in_size), lambda i: (i, 0))]
    flat_params = []
    for w, b in params:
        w = w.astype(jnp.float32)                    # no-op if already stored in kernel dtype
        b = b.astype(jnp.float32).reshape(1, -1)
        flat_params += [w, b]
        in_specs.append(pl.BlockSpec(w.shape, lambda i: (0, 0)))
        in_specs.append(pl.BlockSpec(b.shape, lambda i: (0, 0)))

    # Ragged last block handled by Pallas (no jnp.pad copy of the whole input); OOB rows of the
    # final block are dropped on copy-out, so no extra HBM pass and no OOB writes.
    grid = (_cdiv(batch, TILE_B),)

    out = pl.pallas_call(
        _make_mlp_kernel(num_linear),
        out_shape=jax.ShapeDtypeStruct((batch, out_size), jnp.float32),
        grid=grid,
        in_specs=in_specs,
        out_specs=pl.BlockSpec((TILE_B, out_size), lambda i: (i, 0)),
        compiler_params=pltpu.CompilerParams(
            dimension_semantics=("parallel",),   # megacore sharding of the batch axis on v7x
            vmem_limit_bytes=vmem_limit,
        ),
    )(x, *flat_params)

    policy = out[:, :-1]
    value = out[:, -1:]
    return policy, value


def init_params(key, in_size, units, out_size):
    """Deterministic init mimicking PyTorch nn.Linear defaults (uniform +- 1/sqrt(fan_in))."""
    dims = [in_size] + list(units) + [out_size]
    params = []
    for i in range(len(dims) - 1):
        fan_in, fan_out = dims[i], dims[i + 1]
        key, kw, kb = jax.random.split(key, 3)
        bound = 1.0 / jnp.sqrt(float(fan_in))
        w = jax.random.uniform(kw, (fan_in, fan_out), jnp.float32, -bound, bound)
        b = jax.random.uniform(kb, (1, fan_out), jnp.float32, -bound, bound)
        params.append((w, b))
    return params


def _reference_forward(x, params, flatten=True):
    """Pure-JAX reference mirroring the PyTorch forward (eval mode), f32 throughout."""
    if flatten:
        x = x.reshape(x.shape[0], -1)
    h = x.astype(jnp.float32)
    n = len(params)
    for i, (w, b) in enumerate(params):
        h = jnp.dot(h, w, preferred_element_type=jnp.float32) + b.reshape(1, -1)
        if i < n - 1:
            h = jnp.maximum(h, 0.0)
    return h[:, :-1], jnp.tanh(h[:, -1:])


if __name__ == "__main__":
    # Connect-4-ish small shapes: 2 player planes on a 6x7 board, 7 columns + 1 value.
    batch = 2
    C, H, W = 2, 6, 7
    in_size = C * H * W            # 84
    units = [32, 32]
    out_size = 7 + 1               # 7 policy logits + 1 value

    key = jax.random.PRNGKey(0)
    key, kx = jax.random.split(key)
    x = jax.random.normal(kx, (batch, C, H, W), dtype=jnp.float32)
    params = init_params(key, in_size, units, out_size)

    policy, value = simple_alpha_connect4_forward(x, params, flatten=True)
    jax.block_until_ready((policy, value))

    p_ref, v_ref = _reference_forward(x, params, flatten=True)
    assert policy.shape == (batch, out_size - 1)
    assert value.shape == (batch, 1)
    assert jnp.allclose(policy, p_ref, atol=5e-3, rtol=5e-3)
    assert jnp.allclose(value, v_ref, atol=5e-3, rtol=5e-3)

    # Second check: multi-tile grid with a ragged last block (exercises the megacore split path
    # and the partial-block store masking).
    x2 = jax.random.normal(jax.random.PRNGKey(1), (20, C, H, W), dtype=jnp.float32)
    p2, v2 = simple_alpha_connect4_forward(x2, params, flatten=True)
    jax.block_until_ready((p2, v2))
    p2_ref, v2_ref = _reference_forward(x2, params, flatten=True)
    assert p2.shape == (20, out_size - 1) and v2.shape == (20, 1)
    assert jnp.allclose(p2, p2_ref, atol=5e-3, rtol=5e-3)
    assert jnp.allclose(v2, v2_ref, atol=5e-3, rtol=5e-3)

    print("KERNEL_OK")
</pallas_src>

<mosaic_0001>
module attributes {stable_mosaic.version = 11 : i64} {
  func.func @kernel(%arg0: i32, %arg1: memref<8x84xf32, #tpu.memory_space<vmem>>, %arg2: memref<84x32xf32, #tpu.memory_space<vmem>>, %arg3: memref<1x32xf32, #tpu.memory_space<vmem>>, %arg4: memref<32x32xf32, #tpu.memory_space<vmem>>, %arg5: memref<1x32xf32, #tpu.memory_space<vmem>>, %arg6: memref<32x8xf32, #tpu.memory_space<vmem>>, %arg7: memref<1x8xf32, #tpu.memory_space<vmem>>, %arg8: memref<8x8xf32, #tpu.memory_space<vmem>>) attributes {dimension_semantics = [#tpu.dimension_semantics<parallel>], iteration_bounds = array<i64: 1>, scalar_prefetch = 0 : i64, scratch_operands = 0 : i64, tpu.core_type = #tpu.core_type<tc>, window_params = [{transform_indices = @transform_0, window_bounds = array<i64: 8, 84>}, {pipeline_mode = #tpu.pipeline_mode<synchronous>, transform_indices = @transform_1, window_bounds = array<i64: 84, 32>}, {pipeline_mode = #tpu.pipeline_mode<synchronous>, transform_indices = @transform_2, window_bounds = array<i64: 1, 32>}, {pipeline_mode = #tpu.pipeline_mode<synchronous>, transform_indices = @transform_3, window_bounds = array<i64: 32, 32>}, {pipeline_mode = #tpu.pipeline_mode<synchronous>, transform_indices = @transform_4, window_bounds = array<i64: 1, 32>}, {pipeline_mode = #tpu.pipeline_mode<synchronous>, transform_indices = @transform_5, window_bounds = array<i64: 32, 8>}, {pipeline_mode = #tpu.pipeline_mode<synchronous>, transform_indices = @transform_6, window_bounds = array<i64: 1, 8>}, {transform_indices = @transform_7, window_bounds = array<i64: 8, 8>}]} {
    %c0 = arith.constant 0 : index
    %c0_0 = arith.constant 0 : index
    %0 = vector.load %arg1[%c0, %c0_0] : memref<8x84xf32, #tpu.memory_space<vmem>>, vector<8x84xf32>
    %c0_1 = arith.constant 0 : index
    %c0_2 = arith.constant 0 : index
    %1 = vector.load %arg2[%c0_1, %c0_2] : memref<84x32xf32, #tpu.memory_space<vmem>>, vector<84x32xf32>
    %c0_3 = arith.constant 0 : index
    %c0_4 = arith.constant 0 : index
    %2 = vector.load %arg3[%c0_3, %c0_4] : memref<1x32xf32, #tpu.memory_space<vmem>>, vector<1x32xf32>
    %cst = arith.constant dense<0.000000e+00> : vector<8x32xf32>
    %3 = tpu.matmul %0, %1, %cst {dimension_numbers = #tpu.dot_dimension_numbers<[1], [0], [0], [1], [0, 0, 1, 1], [], []>} : vector<8x84xf32>, vector<84x32xf32>, vector<8x32xf32> -> vector<8x32xf32>
    %4 = vector.broadcast %2 : vector<1x32xf32> to vector<8x32xf32>
    %5 = arith.addf %3, %4 : vector<8x32xf32>
    %cst_5 = arith.constant 0.000000e+00 : f32
    %6 = vector.broadcast %cst_5 : f32 to vector<8x32xf32>
    %7 = arith.maximumf %5, %6 : vector<8x32xf32>
    %c0_6 = arith.constant 0 : index
    %c0_7 = arith.constant 0 : index
    %8 = vector.load %arg4[%c0_6, %c0_7] : memref<32x32xf32, #tpu.memory_space<vmem>>, vector<32x32xf32>
    %c0_8 = arith.constant 0 : index
    %c0_9 = arith.constant 0 : index
    %9 = vector.load %arg5[%c0_8, %c0_9] : memref<1x32xf32, #tpu.memory_space<vmem>>, vector<1x32xf32>
    %cst_10 = arith.constant dense<0.000000e+00> : vector<8x32xf32>
    %10 = tpu.matmul %7, %8, %cst_10 {dimension_numbers = #tpu.dot_dimension_numbers<[1], [0], [0], [1], [0, 0, 1, 1], [], []>} : vector<8x32xf32>, vector<32x32xf32>, vector<8x32xf32> -> vector<8x32xf32>
    %11 = vector.broadcast %9 : vector<1x32xf32> to vector<8x32xf32>
    %12 = arith.addf %10, %11 : vector<8x32xf32>
    %cst_11 = arith.constant 0.000000e+00 : f32
    %13 = vector.broadcast %cst_11 : f32 to vector<8x32xf32>
    %14 = arith.maximumf %12, %13 : vector<8x32xf32>
    %c0_12 = arith.constant 0 : index
    %c0_13 = arith.constant 0 : index
    %15 = vector.load %arg6[%c0_12, %c0_13] : memref<32x8xf32, #tpu.memory_space<vmem>>, vector<32x8xf32>
    %c0_14 = arith.constant 0 : index
    %c0_15 = arith.constant 0 : index
    %16 = vector.load %arg7[%c0_14, %c0_15] : memref<1x8xf32, #tpu.memory_space<vmem>>, vector<1x8xf32>
    %cst_16 = arith.constant dense<0.000000e+00> : vector<8x8xf32>
    %17 = tpu.matmul %14, %15, %cst_16 {dimension_numbers = #tpu.dot_dimension_numbers<[1], [0], [0], [1], [0, 0, 1, 1], [], []>} : vector<8x32xf32>, vector<32x8xf32>, vector<8x8xf32> -> vector<8x8xf32>
    %18 = vector.broadcast %16 : vector<1x8xf32> to vector<8x8xf32>
    %19 = arith.addf %17, %18 : vector<8x8xf32>
    %20 = tpu.iota {dimensions = array<i32: 1>} : vector<8x8xi32>
    %c7_i32 = arith.constant 7 : i32
    %21 = vector.broadcast %c7_i32 : i32 to vector<8x8xi32>
    %22 = arith.cmpi eq, %20, %21 : vector<8x8xi32>
    %23 = math.tanh %19 : vector<8x8xf32>
    %24 = arith.select %22, %23, %19 : vector<8x8xi1>, vector<8x8xf32>
    %c0_17 = arith.constant 0 : index
    %c0_18 = arith.constant 0 : index
    %25 = vector.load %arg8[%c0_17, %c0_18] : memref<8x8xf32, #tpu.memory_space<vmem>>, vector<8x8xf32>
    tpu.vector_store %arg8[%c0_17, %c0_18], %24 {strides = array<i32>} : memref<8x8xf32, #tpu.memory_space<vmem>>, vector<8x8xf32>,
    return
  }
  func.func @transform_0(%arg0: i32) -> (i32, i32) {
    %c0_i32 = arith.constant 0 : i32
    %c0_i32_0 = arith.constant 0 : i32
    return %arg0, %c0_i32 : i32, i32
  }
  func.func @transform_1(%arg0: i32) -> (i32, i32) {
    %c0_i32 = arith.constant 0 : i32
    %c0_i32_0 = arith.constant 0 : i32
    %c0_i32_1 = arith.constant 0 : i32
    return %c0_i32, %c0_i32_0 : i32, i32
  }
  func.func @transform_2(%arg0: i32) -> (i32, i32) {
    %c0_i32 = arith.constant 0 : i32
    %c0_i32_0 = arith.constant 0 : i32
    %c0_i32_1 = arith.constant 0 : i32
    return %c0_i32, %c0_i32_0 : i32, i32
  }
  func.func @transform_3(%arg0: i32) -> (i32, i32) {
    %c0_i32 = arith.constant 0 : i32
    %c0_i32_0 = arith.constant 0 : i32
    %c0_i32_1 = arith.constant 0 : i32
    return %c0_i32, %c0_i32_0 : i32, i32
  }
  func.func @transform_4(%arg0: i32) -> (i32, i32) {
    %c0_i32 = arith.constant 0 : i32
    %c0_i32_0 = arith.constant 0 : i32
    %c0_i32_1 = arith.constant 0 : i32
    return %c0_i32, %c0_i32_0 : i32, i32
  }
  func.func @transform_5(%arg0: i32) -> (i32, i32) {
    %c0_i32 = arith.constant 0 : i32
    %c0_i32_0 = arith.constant 0 : i32
    %c0_i32_1 = arith.constant 0 : i32
    return %c0_i32, %c0_i32_0 : i32, i32
  }
  func.func @transform_6(%arg0: i32) -> (i32, i32) {
    %c0_i32 = arith.constant 0 : i32
    %c0_i32_0 = arith.constant 0 : i32
    %c0_i32_1 = arith.constant 0 : i32
    return %c0_i32, %c0_i32_0 : i32, i32
  }
  func.func @transform_7(%arg0: i32) -> (i32, i32) {
    %c0_i32 = arith.constant 0 : i32
    %c0_i32_0 = arith.constant 0 : i32
    return %arg0, %c0_i32 : i32, i32
  }
}

</mosaic_0001>

<bundles_post_ra>
// kernel: simple_alpha_connect4_forward.1
= control target key start
LH: loop header
LB: loop body
LE: loop exit
PB: predicated region body
PF: predicated region fallthrough
CT: control target
= control target key end

     0   :  { %vm46_vm0 = vcmask 1043456   ;;  %vm42_vm1 = vcmask 687104   ;;  %vm79_vm2 = vcmask 261120   ;;  %v135_v29 = vlaneseq  ;;  %s304_s0 = inlined_call_operand.vmem [shape: f32[2,84], index: 0, kind: input, shape index: {}]   ;;  %s305_s1 = inlined_call_operand.vmem [shape: f32[84,32], index: 1, kind: input, shape index: {}]   ;;  %s306_s2 = inlined_call_operand.vmem [shape: f32[1,32], index: 2, kind: input, shape index: {}]   ;;  %s307_s3 = inlined_call_operand.vmem [shape: f32[32,32], index: 3, kind: input, shape index: {}]   ;;  %s308_s4 = inlined_call_operand.vmem [shape: f32[1,32], index: 4, kind: input, shape index: {}]   ;;  %s309_s5 = inlined_call_operand.vmem [shape: f32[32,8], index: 5, kind: input, shape index: {}]   ;;  %s310_s6 = inlined_call_operand.vmem [shape: f32[1,8], index: 6, kind: input, shape index: {}]   ;;  %s311_s7 = inlined_call_operand.vmem [shape: f32[2,8], index: 7, kind: output, shape index: {}]  }
   0x1   :  { %v37_v0 = vld [vmem:[%s305_s1 + $0x50] sm:$0xf]  ;;  %v36_v1 = vld [vmem:[%s305_s1 + $0x48] sm:$0xff]  ;;  %v35_v2 = vld [vmem:[%s305_s1 + $0x40] sm:$0xff]  ;;  %vm140_vm4 = vcmask 64512  }
   0x2   :  { %183 = vmatpush.msk.msra.mxu0 %vm46_vm0, %v37_v0  ;;  %v34_v3 = vld [vmem:[%s305_s1 + $0x38] sm:$0xff]  ;;  %v33_v5 = vld [vmem:[%s305_s1 + $0x30] sm:$0xff]  ;;  %v32_v6 = vld [vmem:[%s305_s1 + $0x28] sm:$0xff]  ;;  %v136_v32 = vand.u32 127, %v135_v29 }
   0x3   :  { %v74_v4 = vld [vmem:[%s307_s3 + $0x18] sm:$0xff]  ;;  %v31_v7 = vld [vmem:[%s305_s1 + $0x20] sm:$0xff]  ;;  %v29_v9 = vld [vmem:[%s305_s1 + $0x10] sm:$0xff] }
   0x4   :  { %56 = vmatpush.msra.mxu0 %v36_v1  ;;  %95 = vmatpush.msra.mxu1 %v74_v4  ;;  %v30_v8 = vld [vmem:[%s305_s1 + $0x18] sm:$0xff]  ;;  %v28_v10 = vld [vmem:[%s305_s1 + $0x8] sm:$0xff]  ;;  %v27_v11 = vld [vmem:[%s305_s1] sm:$0xff]  ;;  %vm137_vm3 = vcmp.eq.s32.totalorder %v136_v32, 7 }
   0x5   :  { %v26_v12 = vld [vmem:[%s304_s0] sm:$0xff]  ;;  %v73_v13 = vld [vmem:[%s307_s3 + $0x10] sm:$0xff]  ;;  %v72_v14 = vld [vmem:[%s307_s3 + $0x8] sm:$0xff] }
   0x6   :  { %57 = vmatpush.msra.mxu0 %v35_v2  ;;  %96 = vmatpush.msra.mxu1 %v73_v13  ;;  %v71_v15 = vld [vmem:[%s307_s3] sm:$0xff]  ;;  %v107_v16 = vld [vmem:[%s309_s5 + $0x18] sm:$0xff]  ;;  %v106_v21 = vld [vmem:[%s309_s5 + $0x10] sm:$0xff] }
   0x7   :  { %127 = vmatpush.msra.mxu2 %v107_v16  ;;  %v187_v17 = vld [vmem:[%s306_s2] ss:$0 sm:$0xff]  ;;  %v105_v22 = vld [vmem:[%s309_s5 + $0x8] sm:$0xff] }
   0x8   :  { %58 = vmatpush.msra.mxu0 %v34_v3  ;;  %97 = vmatpush.msra.mxu1 %v72_v14  ;;  %v104_v23 = vld [vmem:[%s309_s5] sm:$0xff] }
   0x9   :  { %128 = vmatpush.msra.mxu2 %v106_v21  ;;  %v188_v24 = vld [vmem:[%s308_s4] ss:$0 sm:$0xff] }
   0xa   :  { %59 = vmatpush.msra.mxu0 %v33_v5  ;;  %98 = vmatpush.msra.mxu1 %v71_v15  ;;  %v189_v28 = vld [vmem:[%s310_s6] ss:$0 sm:$0xff] }
   0xb   :  { %129 = vmatpush.msra.mxu2 %v105_v22 }
   0xc   :  { %60 = vmatpush.msra.mxu0 %v32_v6 }
   0xd   :  { %130 = vmatpush.msra.mxu2 %v104_v23 }
   0xe   :  { %61 = vmatpush.msra.mxu0 %v31_v7 }
  0x10   :  { %62 = vmatpush.msra.mxu0 %v30_v8 }
  0x12   :  { %63 = vmatpush.msra.mxu0 %v29_v9 }
  0x14   :  { %64 = vmatpush.msra.mxu0 %v28_v10 }
  0x16   :  { %65 = vmatpush.msra.mxu0 %v27_v11 }
  0x17   :  { %184 = vmatmul.msk.f32.vlgmr.msra.gmra.mxu0 %vm42_vm1, %v26_v12 }
  0x94   :  { %v67_v18 = vpop.f32.mrf.mxu0 }
  0x95   :  { %v68_v19 = vadd.f32 %v187_v17, %v67_v18 }
  0x97   :  { %v70_v20 = vmax.f32 %v68_v19, 0.0 }
  0x99   :  { %185 = vmatmul.msk.f32.vlgmr.msra.gmra.mxu1 %vm79_vm2, %v70_v20 }
 0x116   :  { %v100_v25 = vpop.f32.mrf.mxu1 }
 0x117   :  { %v101_v26 = vadd.f32 %v188_v24, %v100_v25 }
 0x119   :  { %v103_v27 = vmax.f32 %v101_v26, 0.0 }
 0x11b   :  { %186 = vmatmul.msk.f32.vlgmr.msra.gmra.mxu2 %vm79_vm2, %v103_v27 }
 0x19e   :  { %v132_v30 = vpop.f32.mrf.mxu2 }
 0x19f   :  { %v133_v31 = vadd.f32 %v189_v28, %v132_v30 }
 0x1a1   :  { %190 = vtanh.f32 %v133_v31 }
 0x1a7   :  { %v191_v33 = vpop.eup %190 }
 0x1a8   :  { %v139_v34 = vsel %vm137_vm3, %v191_v33, %v133_v31 }
 0x1a9   :  { %141 = vst.msk [vmem:[#allocation2] sm:$0xff] %vm140_vm4, %v139_v34 }
 0x1b0   :  { %v160_v35 = vld [vmem:[#allocation2] sm:$0x3] }
 0x1b1   :  { %161 = vst [vmem:[%s311_s7] sm:$0x3] %v160_v35 }

</bundles_post_ra>
